<compile_context>
chip_gen: v7x
topology: tpu7x:2x2x1
jax: 0.10.0
libtpu: 0.0.40
codegen_flags: <defaults>
</compile_context>

<pallas_src>
import functools

import jax
import jax.numpy as jnp
from jax.experimental import pallas as pl
from jax.experimental.pallas import tpu as pltpu

_INV_SQRT2 = 0.7071067811865476


def _conv_gelu_kernel(w_ref, x_ref, o_ref, *, C, K, W, HW):
    # w_ref : (C*K*K,)    SMEM  (scalar taps)
    # x_ref : (C, Bt, HW) VMEM  (channel-major, flattened spatial)
    # o_ref : (Bt, HW)    VMEM  (lane-dense full-width slab)
    bt_hw = o_ref.shape

    # One accumulator per (ki, kj) tap offset.  The channel loop is pure VPU
    # multiply-adds; spatial shifts are deferred to the epilogue so the XLU
    # roll count is K*K-1, independent of C.
    parts = [[jnp.zeros(bt_hw, dtype=jnp.float32) for _ in range(K)]
             for _ in range(K)]

    for c in range(C):
        xc = x_ref[c]                                    # (Bt, HW) free view
        for ki in range(K):
            for kj in range(K):
                w = w_ref[c * K * K + ki * K + kj]       # scalar from SMEM
                parts[ki][kj] = parts[ki][kj] + xc * w

    # Column shifts (within each kernel row): row_acc[ki][b, p] =
    #   sum_{c,kj} w[c,ki,kj] * x[c, b, p + kj].
    row_acc = []
    for ki in range(K):
        r = parts[ki][0]
        for kj in range(1, K):
            r = r + pltpu.roll(parts[ki][kj], HW - kj, axis=1)
        row_acc.append(r)

    # Row shifts: acc[b, p] = sum_ki row_acc[ki][b, p + ki*W].
    acc = row_acc[0]
    for ki in range(1, K):
        acc = acc + pltpu.roll(row_acc[ki], HW - ki * W, axis=1)

    # Exact (erf-based) GELU, matching torch.nn.GELU() default.
    y = 0.5 * acc * (1.0 + jax.lax.erf(acc * jnp.float32(_INV_SQRT2)))
    o_ref[...] = y.astype(o_ref.dtype)


def _pick_batch_tile(B, C, HW):
    """Largest multiple-of-8 divisor of B that fits a conservative VMEM budget
    and leaves >= 2 grid steps (v7x megacore); otherwise the full batch."""
    per_image = (C + 1) * HW * 4 * 2          # double-buffered input + output, f32
    max_bt = max(1, (8 * 1024 * 1024) // max(per_image, 1))
    candidates = [d for d in range(8, B, 8) if B % d == 0 and d <= max_bt]
    if candidates:
        return max(candidates)
    return B                                   # single step; block dims == full dims


def eca_layer_two_forward(x, weight):
    """x: (B, C, H, W) f32, weight: (1, C, K, K) f32 -> (B, 1, H-K+1, W-K+1) f32."""
    B, C, H, W = x.shape
    _, _, K, _ = weight.shape
    Ho, Wo = H - K + 1, W - K + 1
    HW = H * W

    # Lane-dense, channel-major flattened images: (C, B, H*W).
    x_flat = jnp.transpose(x, (1, 0, 2, 3)).reshape(C, B, HW).astype(jnp.float32)
    # Flat weights for scalar SMEM reads: index = c*K*K + ki*K + kj.
    w_flat = weight.reshape(-1).astype(jnp.float32)

    Bt = _pick_batch_tile(B, C, HW)
    grid = (B // Bt,)

    kernel = functools.partial(_conv_gelu_kernel, C=C, K=K, W=W, HW=HW)

    out_flat = pl.pallas_call(
        kernel,
        out_shape=jax.ShapeDtypeStruct((B, HW), jnp.float32),
        grid_spec=pltpu.PrefetchScalarGridSpec(
            num_scalar_prefetch=0,
            grid=grid,
            in_specs=[
                pl.BlockSpec(memory_space=pltpu.MemorySpace.SMEM),   # weights
                pl.BlockSpec((C, Bt, HW), lambda b: (0, b, 0)),      # images
            ],
            out_specs=pl.BlockSpec((Bt, HW), lambda b: (b, 0)),
        ),
        compiler_params=pltpu.CompilerParams(
            dimension_semantics=("parallel",)),
    )(w_flat, x_flat)

    # Slice the "valid" convolution window out of the full-width slab.
    return out_flat.reshape(B, 1, H, W)[:, :, :Ho, :Wo]


if __name__ == "__main__":
    # Small shapes consistent with the module: channel=4, k_size=3.
    B, C, H, W = 2, 4, 16, 16
    K = 3

    key = jax.random.PRNGKey(0)
    kx, kw = jax.random.split(key)
    x = jax.random.normal(kx, (B, C, H, W), dtype=jnp.float32)
    # Deterministic Conv2d(channel, 1, k_size, bias=False) weight,
    # scaled like PyTorch's default kaiming-uniform bound 1/sqrt(C*K*K).
    bound = 1.0 / jnp.sqrt(jnp.float32(C * K * K))
    weight = jax.random.uniform(kw, (1, C, K, K), dtype=jnp.float32,
                                minval=-bound, maxval=bound)

    y = eca_layer_two_forward(x, weight)
    jax.block_until_ready(y)

    # Pure-JAX reference check (conv "valid" + exact GELU).
    ref = jax.lax.conv_general_dilated(
        x, weight, window_strides=(1, 1), padding="VALID",
        dimension_numbers=("NCHW", "OIHW", "NCHW"))
    ref = 0.5 * ref * (1.0 + jax.lax.erf(ref / jnp.sqrt(2.0)))
    assert y.shape == (B, 1, H - K + 1, W - K + 1)
    assert jnp.allclose(y, ref, atol=1e-5, rtol=1e-5)

    print("KERNEL_OK")
</pallas_src>

<mosaic_0001>
module attributes {stable_mosaic.version = 11 : i64} {
  func.func @_conv_gelu_kernel(%arg0: i32, %arg1: memref<36xf32, #tpu.memory_space<smem>>, %arg2: memref<4x2x256xf32, #tpu.memory_space<vmem>>, %arg3: memref<2x256xf32, #tpu.memory_space<vmem>>) attributes {dimension_semantics = [#tpu.dimension_semantics<parallel>], iteration_bounds = array<i64: 1>, scalar_prefetch = 0 : i64, scratch_operands = 0 : i64, tpu.core_type = #tpu.core_type<tc>, window_params = [{transform_indices = @transform_0, window_bounds = array<i64: 36>}, {transform_indices = @transform_1, window_bounds = array<i64: 4, 2, 256>}, {transform_indices = @transform_2, window_bounds = array<i64: 2, 256>}]} {
    %cst = arith.constant 0.000000e+00 : f32
    %0 = vector.broadcast %cst : f32 to vector<2x256xf32>
    %cst_0 = arith.constant 0.000000e+00 : f32
    %1 = vector.broadcast %cst_0 : f32 to vector<2x256xf32>
    %cst_1 = arith.constant 0.000000e+00 : f32
    %2 = vector.broadcast %cst_1 : f32 to vector<2x256xf32>
    %cst_2 = arith.constant 0.000000e+00 : f32
    %3 = vector.broadcast %cst_2 : f32 to vector<2x256xf32>
    %cst_3 = arith.constant 0.000000e+00 : f32
    %4 = vector.broadcast %cst_3 : f32 to vector<2x256xf32>
    %cst_4 = arith.constant 0.000000e+00 : f32
    %5 = vector.broadcast %cst_4 : f32 to vector<2x256xf32>
    %cst_5 = arith.constant 0.000000e+00 : f32
    %6 = vector.broadcast %cst_5 : f32 to vector<2x256xf32>
    %cst_6 = arith.constant 0.000000e+00 : f32
    %7 = vector.broadcast %cst_6 : f32 to vector<2x256xf32>
    %cst_7 = arith.constant 0.000000e+00 : f32
    %8 = vector.broadcast %cst_7 : f32 to vector<2x256xf32>
    %c0 = arith.constant 0 : index
    %c0_8 = arith.constant 0 : index
    %c0_9 = arith.constant 0 : index
    %9 = vector.load %arg2[%c0, %c0_8, %c0_9] : memref<4x2x256xf32, #tpu.memory_space<vmem>>, vector<1x2x256xf32>
    %10 = vector.shape_cast %9 : vector<1x2x256xf32> to vector<2x256xf32>
    %c0_10 = arith.constant 0 : index
    %11 = memref.load %arg1[%c0_10] : memref<36xf32, #tpu.memory_space<smem>>
    %12 = vector.broadcast %11 : f32 to vector<2x256xf32>
    %13 = arith.mulf %10, %12 : vector<2x256xf32>
    %14 = arith.addf %0, %13 : vector<2x256xf32>
    %c1 = arith.constant 1 : index
    %15 = memref.load %arg1[%c1] : memref<36xf32, #tpu.memory_space<smem>>
    %16 = vector.broadcast %15 : f32 to vector<2x256xf32>
    %17 = arith.mulf %10, %16 : vector<2x256xf32>
    %18 = arith.addf %1, %17 : vector<2x256xf32>
    %c2 = arith.constant 2 : index
    %19 = memref.load %arg1[%c2] : memref<36xf32, #tpu.memory_space<smem>>
    %20 = vector.broadcast %19 : f32 to vector<2x256xf32>
    %21 = arith.mulf %10, %20 : vector<2x256xf32>
    %22 = arith.addf %2, %21 : vector<2x256xf32>
    %c3 = arith.constant 3 : index
    %23 = memref.load %arg1[%c3] : memref<36xf32, #tpu.memory_space<smem>>
    %24 = vector.broadcast %23 : f32 to vector<2x256xf32>
    %25 = arith.mulf %10, %24 : vector<2x256xf32>
    %26 = arith.addf %3, %25 : vector<2x256xf32>
    %c4 = arith.constant 4 : index
    %27 = memref.load %arg1[%c4] : memref<36xf32, #tpu.memory_space<smem>>
    %28 = vector.broadcast %27 : f32 to vector<2x256xf32>
    %29 = arith.mulf %10, %28 : vector<2x256xf32>
    %30 = arith.addf %4, %29 : vector<2x256xf32>
    %c5 = arith.constant 5 : index
    %31 = memref.load %arg1[%c5] : memref<36xf32, #tpu.memory_space<smem>>
    %32 = vector.broadcast %31 : f32 to vector<2x256xf32>
    %33 = arith.mulf %10, %32 : vector<2x256xf32>
    %34 = arith.addf %5, %33 : vector<2x256xf32>
    %c6 = arith.constant 6 : index
    %35 = memref.load %arg1[%c6] : memref<36xf32, #tpu.memory_space<smem>>
    %36 = vector.broadcast %35 : f32 to vector<2x256xf32>
    %37 = arith.mulf %10, %36 : vector<2x256xf32>
    %38 = arith.addf %6, %37 : vector<2x256xf32>
    %c7 = arith.constant 7 : index
    %39 = memref.load %arg1[%c7] : memref<36xf32, #tpu.memory_space<smem>>
    %40 = vector.broadcast %39 : f32 to vector<2x256xf32>
    %41 = arith.mulf %10, %40 : vector<2x256xf32>
    %42 = arith.addf %7, %41 : vector<2x256xf32>
    %c8 = arith.constant 8 : index
    %43 = memref.load %arg1[%c8] : memref<36xf32, #tpu.memory_space<smem>>
    %44 = vector.broadcast %43 : f32 to vector<2x256xf32>
    %45 = arith.mulf %10, %44 : vector<2x256xf32>
    %46 = arith.addf %8, %45 : vector<2x256xf32>
    %c1_11 = arith.constant 1 : index
    %c0_12 = arith.constant 0 : index
    %c0_13 = arith.constant 0 : index
    %47 = vector.load %arg2[%c1_11, %c0_12, %c0_13] : memref<4x2x256xf32, #tpu.memory_space<vmem>>, vector<1x2x256xf32>
    %48 = vector.shape_cast %47 : vector<1x2x256xf32> to vector<2x256xf32>
    %c9 = arith.constant 9 : index
    %49 = memref.load %arg1[%c9] : memref<36xf32, #tpu.memory_space<smem>>
    %50 = vector.broadcast %49 : f32 to vector<2x256xf32>
    %51 = arith.mulf %48, %50 : vector<2x256xf32>
    %52 = arith.addf %14, %51 : vector<2x256xf32>
    %c10 = arith.constant 10 : index
    %53 = memref.load %arg1[%c10] : memref<36xf32, #tpu.memory_space<smem>>
    %54 = vector.broadcast %53 : f32 to vector<2x256xf32>
    %55 = arith.mulf %48, %54 : vector<2x256xf32>
    %56 = arith.addf %18, %55 : vector<2x256xf32>
    %c11 = arith.constant 11 : index
    %57 = memref.load %arg1[%c11] : memref<36xf32, #tpu.memory_space<smem>>
    %58 = vector.broadcast %57 : f32 to vector<2x256xf32>
    %59 = arith.mulf %48, %58 : vector<2x256xf32>
    %60 = arith.addf %22, %59 : vector<2x256xf32>
    %c12 = arith.constant 12 : index
    %61 = memref.load %arg1[%c12] : memref<36xf32, #tpu.memory_space<smem>>
    %62 = vector.broadcast %61 : f32 to vector<2x256xf32>
    %63 = arith.mulf %48, %62 : vector<2x256xf32>
    %64 = arith.addf %26, %63 : vector<2x256xf32>
    %c13 = arith.constant 13 : index
    %65 = memref.load %arg1[%c13] : memref<36xf32, #tpu.memory_space<smem>>
    %66 = vector.broadcast %65 : f32 to vector<2x256xf32>
    %67 = arith.mulf %48, %66 : vector<2x256xf32>
    %68 = arith.addf %30, %67 : vector<2x256xf32>
    %c14 = arith.constant 14 : index
    %69 = memref.load %arg1[%c14] : memref<36xf32, #tpu.memory_space<smem>>
    %70 = vector.broadcast %69 : f32 to vector<2x256xf32>
    %71 = arith.mulf %48, %70 : vector<2x256xf32>
    %72 = arith.addf %34, %71 : vector<2x256xf32>
    %c15 = arith.constant 15 : index
    %73 = memref.load %arg1[%c15] : memref<36xf32, #tpu.memory_space<smem>>
    %74 = vector.broadcast %73 : f32 to vector<2x256xf32>
    %75 = arith.mulf %48, %74 : vector<2x256xf32>
    %76 = arith.addf %38, %75 : vector<2x256xf32>
    %c16 = arith.constant 16 : index
    %77 = memref.load %arg1[%c16] : memref<36xf32, #tpu.memory_space<smem>>
    %78 = vector.broadcast %77 : f32 to vector<2x256xf32>
    %79 = arith.mulf %48, %78 : vector<2x256xf32>
    %80 = arith.addf %42, %79 : vector<2x256xf32>
    %c17 = arith.constant 17 : index
    %81 = memref.load %arg1[%c17] : memref<36xf32, #tpu.memory_space<smem>>
    %82 = vector.broadcast %81 : f32 to vector<2x256xf32>
    %83 = arith.mulf %48, %82 : vector<2x256xf32>
    %84 = arith.addf %46, %83 : vector<2x256xf32>
    %c2_14 = arith.constant 2 : index
    %c0_15 = arith.constant 0 : index
    %c0_16 = arith.constant 0 : index
    %85 = vector.load %arg2[%c2_14, %c0_15, %c0_16] : memref<4x2x256xf32, #tpu.memory_space<vmem>>, vector<1x2x256xf32>
    %86 = vector.shape_cast %85 : vector<1x2x256xf32> to vector<2x256xf32>
    %c18 = arith.constant 18 : index
    %87 = memref.load %arg1[%c18] : memref<36xf32, #tpu.memory_space<smem>>
    %88 = vector.broadcast %87 : f32 to vector<2x256xf32>
    %89 = arith.mulf %86, %88 : vector<2x256xf32>
    %90 = arith.addf %52, %89 : vector<2x256xf32>
    %c19 = arith.constant 19 : index
    %91 = memref.load %arg1[%c19] : memref<36xf32, #tpu.memory_space<smem>>
    %92 = vector.broadcast %91 : f32 to vector<2x256xf32>
    %93 = arith.mulf %86, %92 : vector<2x256xf32>
    %94 = arith.addf %56, %93 : vector<2x256xf32>
    %c20 = arith.constant 20 : index
    %95 = memref.load %arg1[%c20] : memref<36xf32, #tpu.memory_space<smem>>
    %96 = vector.broadcast %95 : f32 to vector<2x256xf32>
    %97 = arith.mulf %86, %96 : vector<2x256xf32>
    %98 = arith.addf %60, %97 : vector<2x256xf32>
    %c21 = arith.constant 21 : index
    %99 = memref.load %arg1[%c21] : memref<36xf32, #tpu.memory_space<smem>>
    %100 = vector.broadcast %99 : f32 to vector<2x256xf32>
    %101 = arith.mulf %86, %100 : vector<2x256xf32>
    %102 = arith.addf %64, %101 : vector<2x256xf32>
    %c22 = arith.constant 22 : index
    %103 = memref.load %arg1[%c22] : memref<36xf32, #tpu.memory_space<smem>>
    %104 = vector.broadcast %103 : f32 to vector<2x256xf32>
    %105 = arith.mulf %86, %104 : vector<2x256xf32>
    %106 = arith.addf %68, %105 : vector<2x256xf32>
    %c23 = arith.constant 23 : index
    %107 = memref.load %arg1[%c23] : memref<36xf32, #tpu.memory_space<smem>>
    %108 = vector.broadcast %107 : f32 to vector<2x256xf32>
    %109 = arith.mulf %86, %108 : vector<2x256xf32>
    %110 = arith.addf %72, %109 : vector<2x256xf32>
    %c24 = arith.constant 24 : index
    %111 = memref.load %arg1[%c24] : memref<36xf32, #tpu.memory_space<smem>>
    %112 = vector.broadcast %111 : f32 to vector<2x256xf32>
    %113 = arith.mulf %86, %112 : vector<2x256xf32>
    %114 = arith.addf %76, %113 : vector<2x256xf32>
    %c25 = arith.constant 25 : index
    %115 = memref.load %arg1[%c25] : memref<36xf32, #tpu.memory_space<smem>>
    %116 = vector.broadcast %115 : f32 to vector<2x256xf32>
    %117 = arith.mulf %86, %116 : vector<2x256xf32>
    %118 = arith.addf %80, %117 : vector<2x256xf32>
    %c26 = arith.constant 26 : index
    %119 = memref.load %arg1[%c26] : memref<36xf32, #tpu.memory_space<smem>>
    %120 = vector.broadcast %119 : f32 to vector<2x256xf32>
    %121 = arith.mulf %86, %120 : vector<2x256xf32>
    %122 = arith.addf %84, %121 : vector<2x256xf32>
    %c3_17 = arith.constant 3 : index
    %c0_18 = arith.constant 0 : index
    %c0_19 = arith.constant 0 : index
    %123 = vector.load %arg2[%c3_17, %c0_18, %c0_19] : memref<4x2x256xf32, #tpu.memory_space<vmem>>, vector<1x2x256xf32>
    %124 = vector.shape_cast %123 : vector<1x2x256xf32> to vector<2x256xf32>
    %c27 = arith.constant 27 : index
    %125 = memref.load %arg1[%c27] : memref<36xf32, #tpu.memory_space<smem>>
    %126 = vector.broadcast %125 : f32 to vector<2x256xf32>
    %127 = arith.mulf %124, %126 : vector<2x256xf32>
    %128 = arith.addf %90, %127 : vector<2x256xf32>
    %c28 = arith.constant 28 : index
    %129 = memref.load %arg1[%c28] : memref<36xf32, #tpu.memory_space<smem>>
    %130 = vector.broadcast %129 : f32 to vector<2x256xf32>
    %131 = arith.mulf %124, %130 : vector<2x256xf32>
    %132 = arith.addf %94, %131 : vector<2x256xf32>
    %c29 = arith.constant 29 : index
    %133 = memref.load %arg1[%c29] : memref<36xf32, #tpu.memory_space<smem>>
    %134 = vector.broadcast %133 : f32 to vector<2x256xf32>
    %135 = arith.mulf %124, %134 : vector<2x256xf32>
    %136 = arith.addf %98, %135 : vector<2x256xf32>
    %c30 = arith.constant 30 : index
    %137 = memref.load %arg1[%c30] : memref<36xf32, #tpu.memory_space<smem>>
    %138 = vector.broadcast %137 : f32 to vector<2x256xf32>
    %139 = arith.mulf %124, %138 : vector<2x256xf32>
    %140 = arith.addf %102, %139 : vector<2x256xf32>
    %c31 = arith.constant 31 : index
    %141 = memref.load %arg1[%c31] : memref<36xf32, #tpu.memory_space<smem>>
    %142 = vector.broadcast %141 : f32 to vector<2x256xf32>
    %143 = arith.mulf %124, %142 : vector<2x256xf32>
    %144 = arith.addf %106, %143 : vector<2x256xf32>
    %c32 = arith.constant 32 : index
    %145 = memref.load %arg1[%c32] : memref<36xf32, #tpu.memory_space<smem>>
    %146 = vector.broadcast %145 : f32 to vector<2x256xf32>
    %147 = arith.mulf %124, %146 : vector<2x256xf32>
    %148 = arith.addf %110, %147 : vector<2x256xf32>
    %c33 = arith.constant 33 : index
    %149 = memref.load %arg1[%c33] : memref<36xf32, #tpu.memory_space<smem>>
    %150 = vector.broadcast %149 : f32 to vector<2x256xf32>
    %151 = arith.mulf %124, %150 : vector<2x256xf32>
    %152 = arith.addf %114, %151 : vector<2x256xf32>
    %c34 = arith.constant 34 : index
    %153 = memref.load %arg1[%c34] : memref<36xf32, #tpu.memory_space<smem>>
    %154 = vector.broadcast %153 : f32 to vector<2x256xf32>
    %155 = arith.mulf %124, %154 : vector<2x256xf32>
    %156 = arith.addf %118, %155 : vector<2x256xf32>
    %c35 = arith.constant 35 : index
    %157 = memref.load %arg1[%c35] : memref<36xf32, #tpu.memory_space<smem>>
    %158 = vector.broadcast %157 : f32 to vector<2x256xf32>
    %159 = arith.mulf %124, %158 : vector<2x256xf32>
    %160 = arith.addf %122, %159 : vector<2x256xf32>
    %c255_i32 = arith.constant 255 : i32
    %161 = tpu.dynamic_rotate %132 by %c255_i32 dim 1 : vector<2x256xf32>, i32 -> vector<2x256xf32>
    %162 = arith.addf %128, %161 : vector<2x256xf32>
    %c254_i32 = arith.constant 254 : i32
    %163 = tpu.dynamic_rotate %136 by %c254_i32 dim 1 : vector<2x256xf32>, i32 -> vector<2x256xf32>
    %164 = arith.addf %162, %163 : vector<2x256xf32>
    %c255_i32_20 = arith.constant 255 : i32
    %165 = tpu.dynamic_rotate %144 by %c255_i32_20 dim 1 : vector<2x256xf32>, i32 -> vector<2x256xf32>
    %166 = arith.addf %140, %165 : vector<2x256xf32>
    %c254_i32_21 = arith.constant 254 : i32
    %167 = tpu.dynamic_rotate %148 by %c254_i32_21 dim 1 : vector<2x256xf32>, i32 -> vector<2x256xf32>
    %168 = arith.addf %166, %167 : vector<2x256xf32>
    %c255_i32_22 = arith.constant 255 : i32
    %169 = tpu.dynamic_rotate %156 by %c255_i32_22 dim 1 : vector<2x256xf32>, i32 -> vector<2x256xf32>
    %170 = arith.addf %152, %169 : vector<2x256xf32>
    %c254_i32_23 = arith.constant 254 : i32
    %171 = tpu.dynamic_rotate %160 by %c254_i32_23 dim 1 : vector<2x256xf32>, i32 -> vector<2x256xf32>
    %172 = arith.addf %170, %171 : vector<2x256xf32>
    %c240_i32 = arith.constant 240 : i32
    %173 = tpu.dynamic_rotate %168 by %c240_i32 dim 1 : vector<2x256xf32>, i32 -> vector<2x256xf32>
    %174 = arith.addf %164, %173 : vector<2x256xf32>
    %c224_i32 = arith.constant 224 : i32
    %175 = tpu.dynamic_rotate %172 by %c224_i32 dim 1 : vector<2x256xf32>, i32 -> vector<2x256xf32>
    %176 = arith.addf %174, %175 : vector<2x256xf32>
    %cst_24 = arith.constant 5.000000e-01 : f32
    %177 = vector.broadcast %cst_24 : f32 to vector<2x256xf32>
    %178 = arith.mulf %177, %176 : vector<2x256xf32>
    %cst_25 = arith.constant 0.707106769 : f32
    %179 = vector.broadcast %cst_25 : f32 to vector<2x256xf32>
    %180 = arith.mulf %176, %179 : vector<2x256xf32>
    %181 = math.erf %180 : vector<2x256xf32>
    %cst_26 = arith.constant 1.000000e+00 : f32
    %182 = vector.broadcast %cst_26 : f32 to vector<2x256xf32>
    %183 = arith.addf %182, %181 : vector<2x256xf32>
    %184 = arith.mulf %178, %183 : vector<2x256xf32>
    %c0_27 = arith.constant 0 : index
    %c0_28 = arith.constant 0 : index
    %185 = vector.load %arg3[%c0_27, %c0_28] : memref<2x256xf32, #tpu.memory_space<vmem>>, vector<2x256xf32>
    tpu.vector_store %arg3[%c0_27, %c0_28], %184 {strides = array<i32>} : memref<2x256xf32, #tpu.memory_space<vmem>>, vector<2x256xf32>,
    return
  }
  func.func @transform_0(%arg0: i32) -> i32 {
    %c0_i32 = arith.constant 0 : i32
    %c0_i32_0 = arith.constant 0 : i32
    return %c0_i32 : i32
  }
  func.func @transform_1(%arg0: i32) -> (i32, i32, i32) {
    %c0_i32 = arith.constant 0 : i32
    %c0_i32_0 = arith.constant 0 : i32
    %c0_i32_1 = arith.constant 0 : i32
    return %c0_i32, %arg0, %c0_i32_0 : i32, i32, i32
  }
  func.func @transform_2(%arg0: i32) -> (i32, i32) {
    %c0_i32 = arith.constant 0 : i32
    %c0_i32_0 = arith.constant 0 : i32
    return %arg0, %c0_i32 : i32, i32
  }
}

</mosaic_0001>

<bundles_post_ra>
// kernel: tpu_custom_call.1
= control target key start
LH: loop header
LB: loop body
LE: loop exit
PB: predicated region body
PF: predicated region fallthrough
CT: control target
= control target key end

     0   :  { %7 = vsyncpa [#allocation5], 0  ;;  %s806_s0 = inlined_call_operand.hbm [shape: f32[36], index: 0, kind: input, shape index: {}]   ;;  %s807_s1 = inlined_call_operand.hbm [shape: f32[4,2,256], index: 1, kind: input, shape index: {}]   ;;  %s808_s2 = inlined_call_operand.hbm [shape: f32[2,256], index: 2, kind: output, shape index: {}]  }
   0x1   :  { %8 = vsyncpa [#allocation3], 0 }
   0x2   :  { %9 = vsyncpa [#allocation4], 0  ;;  %s495_s11 = scalar_lea.hbm %s806_s0, 16 }
   0x3   :  { %p496_p0 = scmp.ne.s32.totalorder %s806_s0, %s495_s11  ;;  %p499_p1 = scmp.lt.u32.totalorder %s495_s11, %s806_s0 }
   0x5   :  { %p501_p2 = pnand %p499_p1, %p496_p0 }
   0x7   :  { %504 = shalt.err (!%p501_p2)
}
   0x8   :  { %s555_s16 = smov [#allocation2]   ;;  %s556_s19 = smov [#allocation6]  }
   0x9   :  { %17 = dma.hbm_to_smem %s806_s0, 16, %s555_s16, [#allocation5]  }
   0xa   :  { %s23_s20 = sshll.u32 %s556_s19, 4  ;;  %s505_s23 = scalar_lea.hbm %s807_s1, 256  ;;  %s24_s20 = int_to_ptr.vmem [resolvable:$true] %s23_s20 }
   0xb   :  { %p506_p3 = scmp.ne.s32.totalorder %s807_s1, %s505_s23  ;;  %p509_p4 = scmp.lt.u32.totalorder %s505_s23, %s807_s1 }
   0xd   :  { %p511_p5 = pnand %p509_p4, %p506_p3 }
   0xf   :  { %514 = shalt.err (!%p511_p5)
}
  0x10   :  { %s515_s28 = scalar_lea.vmem %s24_s20, 256  ;;  %p520_p7 = scmp.lt.s32.totalorder %s24_s20, %s24_s20 }
  0x11   :  { %p516_p6 = scmp.ne.s32.totalorder %s24_s20, %s515_s28  ;;  %p521_p8 = scmp.lt.s32.totalorder %s515_s28, %s515_s28 }
  0x13   :  { %p522_p9 = por %p521_p8, %p520_p7 }
  0x15   :  { %p523_p10 = pnand %p522_p9, %p516_p6 }
  0x17   :  { %526 = shalt.err (!%p523_p10)
}
  0x18   :  { %s557_s0 = smov 64   ;;  %s558_s29 = smov 4  }
  0x19   :  { %29 = dma.hbm_to_vmem [thread:$0]  %s807_s1, 256, %s24_s20, [#allocation3], %s557_s0, %s557_s0, %s558_s29  }
  0x1a   :  { %549 = dma.done.wait [#allocation5], 16  }
  0x1b   :  { %550 = vsyncadd [#allocation5], 4294967280 }
  0x1c   :  { %551 = dma.done.wait [#allocation3], 256  }
  0x1d   :  { %552 = vsyncadd [#allocation3], 4294967040 }
  0x1e   :  { %36 = sfence }
  0x1f   :  { %s452_s4 = sld [smem:[#allocation2 + $0x5]]  ;;  %s461_s5 = sld [smem:[#allocation2 + $0xe]]  ;;  %v192_v0 = vlaneseq  ;;  %v604_v1 = vld [vmem:[#allocation6] sm:$0xf]  ;;  %v559_v2 = vmov 1983009808  }
  0x20   :  { %s470_s6 = sld [smem:[#allocation2 + $0x17]]  ;;  %s479_s7 = sld [smem:[#allocation2 + $0x20]]  ;;  %v190_v3 = vunpack.c.l.s4 %v559_v2  ;;  %v606_v4 = vld [vmem:[#allocation6 + $0x4] sm:$0xf]  ;;  %v612_v5 = vld [vmem:[#allocation6 + $0x8] sm:$0xf] }
  0x21   :  { %s451_s8 = sld [smem:[#allocation2 + $0x4]]  ;;  %s608_s9 = sld [smem:[#allocation2 + $0xd]]  ;;  %v614_v6 = vld [vmem:[#allocation6 + $0xc] sm:$0xf]  ;;  %v193_v8 = vshrl.u32 %v192_v0, 7 }
  0x22   :  { %s610_s1 = sld [smem:[#allocation2 + $0x16]]  ;;  %s616_s10 = sld [smem:[#allocation2 + $0x1f]]  ;;  %v191_v12 = vunpack.c.0.s8 %v190_v3 }
  0x23   :  { %s619_s11 = sld [smem:[#allocation2 + $0x7]]  ;;  %s621_s12 = sld [smem:[#allocation2 + $0x10]] }
  0x24   :  { %s624_s13 = sld [smem:[#allocation2 + $0x19]]  ;;  %s626_s14 = sld [smem:[#allocation2 + $0x22]]  ;;  %v646_v22 = vsub.s32 %v191_v12, %v193_v8 }
  0x25   :  { %v59_v7 = vstv %s452_s4  ;;  %v97_v10 = vstv %s461_s5  ;;  %s630_s15 = sld [smem:[#allocation2 + $0x8]]  ;;  %s632_s16 = sld [smem:[#allocation2 + $0x11]] }
  0x26   :  { %v60_v9 = vmul.f32 %v59_v7, %v604_v1  ;;  %v135_v11 = vstv %s470_s6  ;;  %v98_v13 = vmul.f32 %v97_v10, %v606_v4  ;;  %v173_v15 = vstv %s479_s7  ;;  %s635_s17 = sld [smem:[#allocation2 + $0x1a]]  ;;  %s637_s18 = sld [smem:[#allocation2 + $0x23]] }
  0x27   :  { %v136_v14 = vmul.f32 %v135_v11, %v612_v5  ;;  %v174_v16 = vmul.f32 %v173_v15, %v614_v6  ;;  %v55_v17 = vstv %s451_s8  ;;  %v93_v20 = vstv %s608_s9  ;;  %s642_s19 = sld [smem:[#allocation2 + $0x6]]  ;;  %s644_s20 = sld [smem:[#allocation2 + $0xf]] }
  0x28   :  { %v99_v18 = vadd.f32 %v98_v13, %v60_v9  ;;  %v56_v19 = vmul.f32 %v55_v17, %v604_v1  ;;  %v131_v21 = vstv %s610_s1  ;;  %v94_v23 = vmul.f32 %v93_v20, %v606_v4  ;;  %s654_s21 = sld [smem:[#allocation2 + $0x18]]  ;;  %s656_s22 = sld [smem:[#allocation2 + $0x21]] }
  0x29   :  { %v132_v24 = vmul.f32 %v131_v21, %v612_v5  ;;  %v169_v25 = vstv %s616_s10  ;;  %v67_v28 = vstv %s619_s11  ;;  %v105_v29 = vstv %s621_s12  ;;  %s664_s23 = sld [smem:[#allocation2 + $0x3]]  ;;  %s666_s24 = sld [smem:[#allocation2 + $0xc]] }
  0x2a   :  { %v137_v26 = vadd.f32 %v136_v14, %v99_v18  ;;  %v170_v27 = vmul.f32 %v169_v25, %v614_v6  ;;  %v95_v30 = vadd.f32 %v94_v23, %v56_v19  ;;  %v68_v31 = vmul.f32 %v67_v28, %v604_v1  ;;  %s670_s25 = sld [smem:[#allocation2 + $0x15]]  ;;  %s676_s26 = sld [smem:[#allocation2 + $0x1e]] }
  0x2b   :  { %v106_v32 = vmul.f32 %v105_v29, %v606_v4  ;;  %v143_v33 = vstv %s624_s13  ;;  %v181_v36 = vstv %s626_s14  ;;  %v71_v37 = vstv %s630_s15  ;;  %s680_s27 = sld [smem:[#allocation2 + $0x1]]  ;;  %s682_s28 = sld [smem:[#allocation2 + $0xa]] }
  0x2c   :  { %v175_v34 = vadd.f32 %v174_v16, %v137_v26  ;;  %v144_v35 = vmul.f32 %v143_v33, %v612_v5  ;;  %v133_v38 = vadd.f32 %v132_v24, %v95_v30  ;;  %v182_v40 = vmul.f32 %v181_v36, %v614_v6  ;;  %s560_s0 = smov 126   ;;  %s688_s29 = sld [smem:[#allocation2 + $0x13]] }
  0x2d   :  { %v107_v39 = vadd.f32 %v106_v32, %v68_v31  ;;  %v72_v41 = vmul.f32 %v71_v37, %v604_v1  ;;  %v109_v43 = vstv %s632_s16  ;;  %v147_v44 = vstv %s635_s17  ;;  %s692_s30 = sld [smem:[#allocation2 + $0x1c]]  ;;  %s694_s3 = sld [smem:[#allocation2 + $0x2]] }
  0x2e   :  { %v286_v42 = vrot.slane %v175_v34, %v646_v22  ;;  %v185_v45 = vstv %s637_s18  ;;  %v171_v46 = vadd.f32 %v170_v27, %v133_v38  ;;  %v110_v48 = vmul.f32 %v109_v43, %v606_v4  ;;  %s699_s4 = sld [smem:[#allocation2 + $0xb]]  ;;  %s561_s5 = smov 127  }
  0x2f   :  { %v145_v47 = vadd.f32 %v144_v35, %v107_v39  ;;  %v148_v49 = vmul.f32 %v147_v44, %v612_v5  ;;  %v186_v51 = vmul.f32 %v185_v45, %v614_v6  ;;  %v63_v52 = vstv %s642_s19  ;;  %s704_s6 = sld [smem:[#allocation2 + $0x14]]  ;;  %s706_s7 = sld [smem:[#allocation2 + $0x1d]] }
  0x30   :  { %290 = vrot.lane.b32.xlu1 %v286_v42, %s560_s0  ;;  %v287_v50 = vcombine.high %v286_v42, %v286_v42  ;;  %v101_v53 = vstv %s644_s20  ;;  %v257_v54 = vrot.slane %v171_v46, %v646_v22  ;;  %v111_v56 = vadd.f32 %v110_v48, %v72_v41  ;;  %s38_s8 = sld [smem:[#allocation2]]  ;;  %s456_s9 = sld [smem:[#allocation2 + $0x9]] }
  0x31   :  { %v183_v55 = vadd.f32 %v182_v40, %v145_v47  ;;  %v64_v57 = vmul.f32 %v63_v52, %v604_v1  ;;  %v102_v58 = vmul.f32 %v101_v53, %v606_v4  ;;  %v139_v59 = vstv %s654_s21  ;;  %s465_s1 = sld [smem:[#allocation2 + $0x12]]  ;;  %s474_s10 = sld [smem:[#allocation2 + $0x1b]] }
  0x32   :  { %v177_v60 = vstv %s656_s22  ;;  %261 = vrot.lane.b32.xlu0 %v257_v54, %s561_s5  ;;  %v258_v61 = vcombine.high %v257_v54, %v257_v54  ;;  %v149_v63 = vadd.f32 %v148_v49, %v111_v56  ;;  %v140_v2 = vmul.f32 %v139_v59, %v612_v5  ;;  %s562_s11 = smov 112   ;;  %s563_s12 = smov 96  }
  0x33   :  { %v315_v62 = vrot.slane %v183_v55, %v646_v22  ;;  %v103_v3 = vadd.f32 %v102_v58, %v64_v57  ;;  %v178_v7 = vmul.f32 %v177_v60, %v614_v6  ;;  %v51_v8 = vstv %s664_s23  ;;  %s564_s13 = smov [#allocation7]  }
  0x34   :  { %292 = vrot.lane.b32.xlu1 %v287_v50, %s560_s0  ;;  %v89_v9 = vstv %s666_s24  ;;  %v187_v11 = vadd.f32 %v186_v51, %v149_v63  ;;  %v127_v13 = vstv %s670_s25  ;;  %v165_v16 = vstv %s676_s26  ;;  %s438_s14 = sshll.u32 %s564_s13, 4  ;;  %s439_s14 = int_to_ptr.vmem [resolvable:$true] %s438_s14 }
  0x35   :  { %v316_v10 = vcombine.high %v315_v62, %v315_v62  ;;  %v90_v12 = vmul.f32 %v89_v9, %v606_v4  ;;  %v141_v14 = vadd.f32 %v140_v2, %v103_v3  ;;  %v128_v15 = vmul.f32 %v127_v13, %v612_v5  ;;  %s527_s15 = scalar_lea.vmem %s439_s14, 64  ;;  %p532_p12 = scmp.lt.s32.totalorder %s439_s14, %s439_s14 }
  0x36   :  { %v52_v17 = vmul.f32 %v51_v8, %v604_v1  ;;  %319 = vrot.lane.b32.xlu0 %v315_v62, %s561_s5  ;;  %v344_v18 = vrot.slane %v187_v11, %v646_v22  ;;  %v166_v19 = vmul.f32 %v165_v16, %v614_v6  ;;  %v43_v20 = vstv %s680_s27  ;;  %p528_p11 = scmp.ne.s32.totalorder %s439_s14, %s527_s15  ;;  %p533_p13 = scmp.lt.s32.totalorder %s527_s15, %s527_s15 }
  0x37   :  { %v81_v21 = vstv %s682_s28  ;;  %v723_v23 = vadd.f32 %v178_v7, %v141_v14  ;;  %v44_v25 = vmul.f32 %v43_v20, %v604_v1  ;;  %v119_v28 = vstv %s688_s29 }
  0x38   :  { %321 = vrot.lane.b32.xlu1 %v316_v10, %s561_s5  ;;  %v91_v24 = vadd.f32 %v90_v12, %v52_v17  ;;  %v82_v26 = vmul.f32 %v81_v21, %v606_v4  ;;  %v345_v27 = vcombine.high %v344_v18, %v344_v18  ;;  %v157_v29 = vstv %s692_s30  ;;  %p534_p0 = por %p533_p13, %p532_p12 }
  0x39   :  { %v47_v30 = vstv %s694_s3  ;;  %v120_v33 = vmul.f32 %v119_v28, %v612_v5  ;;  %v158_v34 = vmul.f32 %v157_v29, %v614_v6  ;;  %v85_v36 = vstv %s699_s4 }
  0x3a   :  { %v129_v31 = vadd.f32 %v128_v15, %v91_v24  ;;  %v83_v32 = vadd.f32 %v82_v26, %v44_v25  ;;  %263 = vrot.lane.b32.xlu0 %v258_v61, %s561_s5  ;;  %v48_v35 = vmul.f32 %v47_v30, %v604_v1  ;;  %v123_v37 = vstv %s704_s6  ;;  %p535_p1 = pnand %p534_p0, %p528_p11 }
  0x3b   :  { %v161_v38 = vstv %s706_s7  ;;  %v86_v41 = vmul.f32 %v85_v36, %v606_v4  ;;  %v124_v42 = vmul.f32 %v123_v37, %v612_v5  ;;  %v39_v51 = vstv %s38_s8 }
  0x3c   :  { %350 = vrot.lane.b32.xlu1 %v345_v27, %s560_s0  ;;  %v167_v39 = vadd.f32 %v166_v19, %v129_v31  ;;  %v121_v40 = vadd.f32 %v120_v33, %v83_v32  ;;  %v162_v45 = vmul.f32 %v161_v38, %v614_v6  ;;  %v77_v52 = vstv %s456_s9 }
  0x3d   :  { %v87_v44 = vadd.f32 %v86_v41, %v48_v35  ;;  %v78_v54 = vmul.f32 %v77_v52, %v606_v4  ;;  %v115_v55 = vstv %s465_s1  ;;  %v153_v56 = vstv %s474_s10 }
  0x3e   :  { %v159_v43 = vadd.f32 %v158_v34, %v121_v40  ;;  %348 = vrot.lane.b32.xlu0 %v344_v18, %s560_s0  ;;  %v116_v57 = vmul.f32 %v115_v55, %v612_v5  ;;  %v40_v58 = vmul.f32 %v39_v51, %v604_v1  ;;  %v154_v59 = vmul.f32 %v153_v56, %v614_v6 }
  0x3f   :  { %v125_v47 = vadd.f32 %v124_v42, %v87_v44  ;;  %v753_v3 = vand.u32 127, %v192_v0 }
  0x40   :  { %v195_v46 = vrot.slane %v159_v43, %v646_v22  ;;  %v79_v60 = vadd.f32 %v78_v54, %v40_v58 }
  0x41   :  { %v163_v49 = vadd.f32 %v162_v45, %v125_v47  ;;  %vm205_vm0 = vcmp.lt.s32.totalorder %v753_v3, 127  ;;  %vm235_vm1 = vcmp.lt.s32.totalorder %v753_v3, 126  ;;  %vm381_vm2 = vcmp.lt.s32.totalorder %v753_v3, 112 }
  0x42   :  { %v196_v48 = vcombine.high %v195_v46, %v195_v46  ;;  %199 = vrot.lane.b32.xlu0 %v195_v46, %s561_s5  ;;  %v117_v61 = vadd.f32 %v116_v57, %v79_v60  ;;  %vm411_vm3 = vcmp.lt.s32.totalorder %v753_v3, 96 }
  0x43   :  { %v227_v50 = vrot.slane %v163_v49, %v646_v22 }
  0x44   :  { %201 = vrot.lane.b32.xlu1 %v196_v48, %s561_s5  ;;  %v155_v62 = vadd.f32 %v154_v59, %v117_v61 }
  0x45   :  { %v228_v53 = vcombine.high %v227_v50, %v227_v50 }
  0x46   :  { %231 = vrot.lane.b32.xlu0 %v227_v50, %s560_s0 }
  0x48   :  { %233 = vrot.lane.b32.xlu1 %v228_v53, %s560_s0 }
  0xa2   :  { %v291_v63 = vpop.permute.xlu1 %290 }
  0xa4   :  { %v262_v2 = vpop.permute.xlu0 %261 }
  0xa6   :  { %v293_v4 = vpop.permute.xlu1 %292 }
  0xa7   :  { %v294_v8 = vsel %vm235_vm1, %v291_v63, %v293_v4  ;;  %v295_v0 = vsel %vm235_vm1, %v293_v4, %v291_v63 }
  0xa8   :  { %v320_v5 = vpop.permute.xlu0 %319  ;;  %v298_v13 = vcombine.low %v294_v8, %v295_v0 }
  0xaa   :  { %v322_v7 = vpop.permute.xlu1 %321  ;;  %v305_v21 = vrot.slane %v298_v13, %v646_v22 }
  0xab   :  { %v323_v1 = vsel %vm205_vm0, %v320_v5, %v322_v7  ;;  %v324_v6 = vsel %vm205_vm0, %v322_v7, %v320_v5 }
  0xac   :  { %v327_v9 = vcombine.low %v323_v1, %v324_v6  ;;  %v264_v10 = vpop.permute.xlu0 %263 }
  0xad   :  { %v265_v11 = vsel %vm205_vm0, %v262_v2, %v264_v10  ;;  %v266_v12 = vsel %vm205_vm0, %v264_v10, %v262_v2 }
  0xae   :  { %v269_v14 = vcombine.low %v265_v11, %v266_v12  ;;  %v351_v15 = vpop.permute.xlu1 %350  ;;  %v334_v16 = vrot.slane %v327_v9, %v646_v22 }
  0xb0   :  { %v276_v17 = vrot.slane %v269_v14, %v646_v22  ;;  %v349_v18 = vpop.permute.xlu0 %348  ;;  %v336_v26 = vadd.f32 %v334_v16, %v723_v23 }
  0xb1   :  { %v352_v19 = vsel %vm235_vm1, %v349_v18, %v351_v15  ;;  %v353_v20 = vsel %vm235_vm1, %v351_v15, %v349_v18 }
  0xb2   :  { %v278_v24 = vadd.f32 %v276_v17, %v167_v39  ;;  %v356_v25 = vcombine.low %v352_v19, %v353_v20 }
  0xb4   :  { %v363_v27 = vrot.slane %v356_v25, %v646_v22  ;;  %v307_v28 = vadd.f32 %v305_v21, %v278_v24  ;;  %v200_v29 = vpop.permute.xlu0 %199 }
  0xb6   :  { %v202_v30 = vpop.permute.xlu1 %201  ;;  %v373_v31 = vrot.slane %v307_v28, %v646_v22  ;;  %v365_v32 = vadd.f32 %v363_v27, %v336_v26 }
  0xb7   :  { %v206_v33 = vsel %vm205_vm0, %v200_v29, %v202_v30  ;;  %v207_v34 = vsel %vm205_vm0, %v202_v30, %v200_v29 }
  0xb8   :  { %v210_v35 = vcombine.low %v206_v33, %v207_v34  ;;  %377 = vrot.lane.b32.xlu0 %v373_v31, %s562_s11  ;;  %v374_v36 = vcombine.high %v373_v31, %v373_v31  ;;  %v403_v23 = vrot.slane %v365_v32, %v646_v22  ;;  %v232_v37 = vpop.permute.xlu0 %231 }
  0xba   :  { %v217_v38 = vrot.slane %v210_v35, %v646_v22  ;;  %v234_v39 = vpop.permute.xlu1 %233  ;;  %379 = vrot.lane.b32.xlu1 %v374_v36, %s562_s11  ;;  %v404_v44 = vcombine.high %v403_v23, %v403_v23 }
  0xbb   :  { %v236_v40 = vsel %vm235_vm1, %v232_v37, %v234_v39  ;;  %v237_v41 = vsel %vm235_vm1, %v234_v39, %v232_v37 }
  0xbc   :  { %v219_v42 = vadd.f32 %v217_v38, %v155_v62  ;;  %v240_v43 = vcombine.low %v236_v40, %v237_v41  ;;  %407 = vrot.lane.b32.xlu0 %v403_v23, %s563_s12 }
  0xbe   :  { %v247_v45 = vrot.slane %v240_v43, %v646_v22  ;;  %409 = vrot.lane.b32.xlu1 %v404_v44, %s563_s12 }
  0xc0   :  { %v249_v46 = vadd.f32 %v247_v45, %v219_v42 }
 0x12a   :  { %v378_v47 = vpop.permute.xlu0 %377 }
 0x12c   :  { %v380_v48 = vpop.permute.xlu1 %379 }
 0x12d   :  { %v382_v49 = vsel %vm381_vm2, %v378_v47, %v380_v48  ;;  %v383_v50 = vsel %vm381_vm2, %v380_v48, %v378_v47 }
 0x12e   :  { %v386_v51 = vcombine.low %v382_v49, %v383_v50  ;;  %v408_v53 = vpop.permute.xlu0 %407 }
 0x130   :  { %v393_v52 = vrot.slane %v386_v51, %v646_v22  ;;  %v410_v54 = vpop.permute.xlu1 %409 }
 0x131   :  { %v412_v55 = vsel %vm411_vm3, %v408_v53, %v410_v54  ;;  %v413_v56 = vsel %vm411_vm3, %v410_v54, %v408_v53 }
 0x132   :  { %v416_v57 = vcombine.low %v412_v55, %v413_v56  ;;  %v395_v58 = vadd.f32 %v393_v52, %v249_v46 }
 0x134   :  { %v423_v59 = vrot.slane %v416_v57, %v646_v22 }
 0x136   :  { %v425_v60 = vadd.f32 %v423_v59, %v395_v58 }
 0x138   :  { %v427_v61 = vmul.f32 0.70710677, %v425_v60  ;;  %v426_v63 = vmul.f32 0.5, %v425_v60 }
 0x13a   :  { %493 = verf.f32 %v427_v61 }
 0x144   :  { %v494_v62 = vpop.eup %493 }
 0x145   :  { %v429_v2 = vadd.f32 1.0, %v494_v62 }
 0x147   :  { %v430_v4 = vmul.f32 %v429_v2, %v426_v63 }
 0x149   :  { %431 = vst [vmem:[#allocation7] sm:$0xf] %v430_v4 }
 0x14a   :  { %538 = shalt.err (!%p535_p1)
}
 0x14b   :  { %s539_s18 = scalar_lea.hbm %s808_s2, 64 }
 0x14c   :  { %p540_p2 = scmp.ne.s32.totalorder %s808_s2, %s539_s18  ;;  %p543_p3 = scmp.lt.u32.totalorder %s539_s18, %s808_s2 }
 0x14e   :  { %p545_p4 = pnand %p543_p3, %p540_p2 }
 0x150   :  { %548 = shalt.err (!%p545_p4)
}
 0x151   :  { %441 = dma.vmem_to_hbm [thread:$0]  %s439_s14, 64, %s808_s2, [#allocation4]  }
 0x152   :  { %553 = dma.done.wait [#allocation4], 64  }
 0x153   :  { %554 = vsyncadd [#allocation4], 4294967232 }
 0x154   :  { %445 = vsyncpa [#allocation3], 1 }
 0x155   :  { %446 = vsyncpa [#allocation4], 1 }
 0x156   :  { %447 = vsyncpa [#allocation5], 1 }

</bundles_post_ra>
